<compile_context>
chip_gen: v7x
topology: tpu7x:2x2x1
jax: 0.10.0
libtpu: 0.0.40
codegen_flags: <defaults>
</compile_context>

<pallas_src>
import functools

import jax
import jax.numpy as jnp
import numpy as np
from jax import lax
from jax.experimental import pallas as pl
from jax.experimental.pallas import tpu as pltpu

_LANE_MAJOR_C_MAX = 16        # batch-on-lanes layout for C <= 16
_TILE_TARGET_BYTES = 1 << 20  # ~1 MiB of logits per grid step
_TN_MIN, _TN_MAX = 128, 8192  # tn is always a multiple of 128 (lane-dim constraint)


def _round_up(x, m):
    return (x + m - 1) // m * m


def _device_kind():
    try:
        return jax.devices()[0].device_kind.lower()
    except Exception:
        return ""


_KIND = _device_kind()
# v5e and older have no bf16 VPU ALUs -> do the argmax compares in f32 there (and on
# unknown hardware, which is the safe default).
_F32_COMPARES = not any(t in _KIND for t in ("v6", "v7", "7x"))
# One leading "parallel" grid split per TensorCore: 2 on dual-TC chips (v7x), else 1.
_NUM_SPLITS = 2 if any(t in _KIND for t in ("v7", "7x")) else 1


def _metric_kernel_lanes(logits_ref, labels_ref, preds_ref, conf_ref, *, num_classes):
    """Batch-on-lanes path (C <= 16): logits (C, TN), labels/preds (1, TN), conf (C, C)."""
    c = num_classes

    @pl.when(pl.program_id(1) == 0)
    def _init():
        conf_ref[...] = jnp.zeros_like(conf_ref)

    x = logits_ref[...].astype(jnp.float32)                      # (C, TN); tiny, upcast is free
    tn = x.shape[1]

    # argmax over the C sublane rows, first-index tie-break (== torch.max index rule).
    cls = lax.broadcasted_iota(jnp.int32, (c, tn), 0)
    col_max = jnp.max(x, axis=0, keepdims=True)                  # (1, TN)
    cand = jnp.where(x == col_max, cls, c)
    pred = jnp.min(cand, axis=0, keepdims=True)                  # (1, TN) int32
    preds_ref[...] = pred                                        # lane-dense, no matvec needed

    # conf[t, p] += onehot(labels) . onehot(pred)^T on the otherwise-idle MXU.
    labels = labels_ref[...]                                     # (1, TN) int32
    onehot_p = (cls == pred).astype(jnp.bfloat16)                # (C, TN) 0/1 exact
    onehot_t = (cls == labels).astype(jnp.bfloat16)              # padded label==C -> zero column
    conf_step = lax.dot_general(
        onehot_t, onehot_p,
        dimension_numbers=(((1,), (1,)), ((), ())),
        preferred_element_type=jnp.float32)                      # (C, C); counts <= TN, exact
    conf_ref[...] += conf_step.astype(jnp.int32)


def _metric_kernel_rows(logits_ref, labels_ref, preds_ref, conf_ref, *,
                        num_classes, upcast):
    """Row-layout path (C > 16, already lane-dense): logits (TN, C), labels/preds (1, TN)."""
    c = num_classes

    @pl.when(pl.program_id(1) == 0)
    def _init():
        conf_ref[...] = jnp.zeros_like(conf_ref)

    x = logits_ref[...]                                          # (TN, C)
    if upcast:
        x = x.astype(jnp.float32)
    tn = x.shape[0]

    # argmax over classes, first-index tie-break.
    col = lax.broadcasted_iota(jnp.int32, (tn, c), 1)
    row_max = jnp.max(x, axis=1, keepdims=True)
    cand = jnp.where(x == row_max, col, c)
    pred = jnp.min(cand, axis=1, keepdims=True)                  # (TN, 1) int32

    # Lane-dense preds via exact bf16 MXU matvecs: class ids split into lo/hi bytes
    # (each <= 255, exact in bf16), so the result is exact for any C.
    onehot_p = (col == pred).astype(jnp.bfloat16)                # (TN, C) 0/1 exact
    cls = lax.broadcasted_iota(jnp.int32, (1, c), 1)
    lo = (cls % 256).astype(jnp.bfloat16)
    preds_lane = lax.dot_general(
        lo, onehot_p, dimension_numbers=(((1,), (1,)), ((), ())),
        preferred_element_type=jnp.float32)                      # (1, TN)
    if c > 256:
        hi = (cls // 256).astype(jnp.bfloat16)
        preds_lane = preds_lane + 256.0 * lax.dot_general(
            hi, onehot_p, dimension_numbers=(((1,), (1,)), ((), ())),
            preferred_element_type=jnp.float32)
    preds_ref[...] = preds_lane.astype(jnp.int32)

    # conf += onehot(labels)^T @ onehot(pred).  Labels arrive lane-dense (1, TN), so the
    # label one-hot is built directly transposed (C, TN) and the matmul is the canonical
    # (M,K)x(K,N) form -> no XLU transpose feeding the MXU.
    labels = labels_ref[...]                                     # (1, TN) int32
    cls_rows = lax.broadcasted_iota(jnp.int32, (c, tn), 0)
    onehot_tt = (cls_rows == labels).astype(jnp.bfloat16)        # (C, TN); padded label==C -> zeros
    conf_step = lax.dot_general(
        onehot_tt, onehot_p, dimension_numbers=(((1,), (0,)), ((), ())),
        preferred_element_type=jnp.float32)                      # (C, C); exact
    conf_ref[...] += conf_step.astype(jnp.int32)


@functools.partial(jax.jit, static_argnames=("num_classes",))
def preds_and_confusion(outputs, labels, num_classes):
    """Returns (preds [N] int32, confusion_matrix [C, C] int32)."""
    outputs = jnp.asarray(outputs)
    if outputs.ndim == 1:
        # torch path: preds = round(sigmoid(x)) == argmax([0, x]) (tie x==0 -> class 0).
        outputs = jnp.stack([jnp.zeros_like(outputs), outputs], axis=1)
    if outputs.dtype != jnp.bfloat16 and outputs.dtype != jnp.float32:
        outputs = outputs.astype(jnp.float32)
    n, c = outputs.shape
    assert c == num_classes, (c, num_classes)
    labels = jnp.asarray(labels).astype(jnp.int32).reshape(1, n)

    lane_major = c <= _LANE_MAJOR_C_MAX

    # Row tile: ~1 MiB of logits per grid step (per-step overhead ~0.35 us), multiple of
    # 128 so the (1, tn) labels/preds lane blocks tile cleanly; shrinks for tiny batches.
    tn = _TILE_TARGET_BYTES // (c * 4)
    tn = max(_TN_MIN, min(_TN_MAX, tn))
    tn = (tn // 128) * 128
    n128 = _round_up(n, 128)
    if n128 <= tn:
        tn = n128
        blocks_total = 1
    else:
        blocks_total = -(-n // tn)
    splits = _NUM_SPLITS if blocks_total >= _NUM_SPLITS else 1
    blocks_total = _round_up(blocks_total, splits)
    bps = blocks_total // splits            # blocks per split
    n_pad = blocks_total * tn

    # Pad: zero logits rows + out-of-range label (== C) -> padded rows hit no conf bin.
    labels_in = jnp.pad(labels, ((0, 0), (0, n_pad - n)), constant_values=c)
    upcast = bool(_F32_COMPARES)

    if lane_major:
        logits_in = jnp.pad(outputs, ((0, n_pad - n), (0, 0))).T          # (C, n_pad)
        logits_spec = pl.BlockSpec((c, tn), lambda s, i: (0, s * bps + i))
        kernel = functools.partial(_metric_kernel_lanes, num_classes=c)
    else:
        logits_in = jnp.pad(outputs, ((0, n_pad - n), (0, 0)))            # (n_pad, C)
        logits_spec = pl.BlockSpec((tn, c), lambda s, i: (s * bps + i, 0))
        kernel = functools.partial(_metric_kernel_rows, num_classes=c, upcast=upcast)

    preds_pad, conf_parts = pl.pallas_call(
        kernel,
        grid=(splits, bps),
        in_specs=[
            logits_spec,
            pl.BlockSpec((1, tn), lambda s, i: (0, s * bps + i)),          # lane-dense labels
        ],
        out_specs=(
            pl.BlockSpec((1, tn), lambda s, i: (0, s * bps + i)),          # lane-dense preds
            pl.BlockSpec((None, c, c), lambda s, i: (s, 0, 0)),            # resident conf acc
        ),
        out_shape=(
            jax.ShapeDtypeStruct((1, n_pad), jnp.int32),
            jax.ShapeDtypeStruct((splits, c, c), jnp.int32),
        ),
        compiler_params=pltpu.CompilerParams(
            dimension_semantics=("parallel", "arbitrary"),
            vmem_limit_bytes=32 * 1024 * 1024,
        ),
    )(logits_in, labels_in)

    preds = preds_pad[0, :n]
    conf = conf_parts.sum(axis=0)
    return preds, conf


def multi_task_classifier_metric(epoch_loss, outputs, labels, phase, num_classes, idx):
    """Mirrors MultiTaskClassifierMetric.forward (preds + conf_mat computed in Pallas)."""
    preds, conf = preds_and_confusion(jnp.asarray(outputs), jnp.asarray(labels), num_classes)
    conf_f = conf.astype(jnp.float32)

    n = conf_f.sum()
    tp = jnp.diag(conf_f)
    row_sum = conf_f.sum(axis=1)   # per-class support (true counts)
    col_sum = conf_f.sum(axis=0)   # per-class predicted counts

    epoch_acc = jnp.trace(conf_f) / n                       # accuracy_score
    precision = jnp.where(col_sum > 0, tp / jnp.maximum(col_sum, 1.0), 0.0)
    recall = jnp.where(row_sum > 0, tp / jnp.maximum(row_sum, 1.0), 0.0)
    f1 = jnp.where(precision + recall > 0,
                   2.0 * precision * recall / jnp.maximum(precision + recall, 1e-30),
                   0.0)
    # sklearn f1_score(average='macro') averages over classes present in labels or preds.
    present = (row_sum + col_sum) > 0
    epoch_f1 = jnp.sum(jnp.where(present, f1, 0.0)) / jnp.maximum(jnp.sum(present), 1.0)

    class_acc = tp / row_sum   # matches torch: conf.diag() / conf.sum(1) (NaN on empty class)

    print('{} Loss {}: {:.4f} Acc: {:.4f} F1 Score: {:.4f}'.format(
        phase, idx, float(epoch_loss), float(epoch_acc), float(epoch_f1)))
    print('Confusion matrix (row=target, column=preds):')
    print(np.asarray(conf))
    print('Class accuracy:')
    print(np.asarray(class_acc))
    print()

    epoch_metrics = {
        'loss': float(epoch_loss),
        'acc': float(epoch_acc),
        'f1': float(epoch_f1),
        'class_acc': np.asarray(class_acc),
        'conf_mat': np.asarray(conf_f),
        'checkpointer': float(epoch_loss),
    }
    return epoch_metrics, np.asarray(preds)


def _reference_check(outputs, labels, num_classes):
    """numpy reference with the same semantics as the torch module."""
    preds, conf = preds_and_confusion(jnp.asarray(outputs), jnp.asarray(labels), num_classes)
    preds = np.asarray(jax.block_until_ready(preds))
    conf = np.asarray(jax.block_until_ready(conf))

    out_np = np.asarray(jnp.asarray(outputs).astype(jnp.float32))
    lab_np = np.asarray(labels).astype(np.int64)
    if out_np.ndim == 1:
        ref_preds = (out_np > 0).astype(np.int64)            # round(sigmoid(x))
    else:
        ref_preds = np.argmax(out_np, axis=1).astype(np.int64)
    ref_conf = np.zeros((num_classes, num_classes), dtype=np.int64)
    np.add.at(ref_conf, (lab_np, ref_preds), 1)

    assert np.array_equal(preds.astype(np.int64), ref_preds), (preds, ref_preds)
    assert np.array_equal(conf.astype(np.int64), ref_conf), (conf, ref_conf)
    return preds, conf


if __name__ == "__main__":
    key = jax.random.PRNGKey(0)
    k1, k2, k3, k4, k5, k6, k7, k8, k9 = jax.random.split(key, 9)

    # 1) tiny problem through the full metric wrapper (batch-on-lanes path, single tile).
    N, C = 16, 4
    outputs = jax.random.normal(k1, (N, C), dtype=jnp.float32)
    labels = jax.random.randint(k2, (N,), 0, C, dtype=jnp.int32)
    metrics, preds = multi_task_classifier_metric(
        0.1234, outputs, labels, phase="val", num_classes=C, idx=0)
    jax.block_until_ready(jnp.asarray(metrics['conf_mat']))
    ref_preds = np.argmax(np.asarray(outputs), axis=1)
    assert np.array_equal(preds, ref_preds)
    assert abs(metrics['acc'] - float(np.mean(ref_preds == np.asarray(labels)))) < 1e-6
    _reference_check(outputs, labels, C)

    # 2) small-C bf16, multiple 8192-row lane-major tiles (+ 2-way split on dual-TC chips).
    N2, C2 = 20000, 4
    outputs2 = jax.random.normal(k3, (N2, C2), dtype=jnp.float32).astype(jnp.bfloat16)
    labels2 = jax.random.randint(k4, (N2,), 0, C2, dtype=jnp.int32)
    _reference_check(outputs2, labels2, C2)

    # 3) medium class count -> row-layout MXU one-hot path, multi-tile, bf16.
    N3, C3 = 12000, 48
    outputs3 = jax.random.normal(k5, (N3, C3), dtype=jnp.float32).astype(jnp.bfloat16)
    labels3 = jax.random.randint(k6, (N3,), 0, C3, dtype=jnp.int32)
    _reference_check(outputs3, labels3, C3)

    # 4) C > 256 -> exercises the exact lo/hi-byte lane-dense preds matvec split.
    N4, C4 = 1000, 300
    outputs4 = jax.random.normal(k7, (N4, C4), dtype=jnp.float32)
    labels4 = jax.random.randint(k8, (N4,), 0, C4, dtype=jnp.int32)
    _reference_check(outputs4, labels4, C4)

    # 5) 1-D logits path: preds = round(sigmoid(x)) == argmax([0, x]).
    N5 = 10
    outputs5 = jax.random.normal(k9, (N5,), dtype=jnp.float32)
    labels5 = (np.arange(N5) % 2).astype(np.int32)
    _reference_check(outputs5, labels5, 2)

    # TODO(synk): sklearn's macro-F1 label-set selection (labels=None) is reproduced via the
    # "class present in labels or preds" mask; exotic zero_division settings are not modeled.

    print("KERNEL_OK")
</pallas_src>

<mosaic_0001>
module attributes {stable_mosaic.version = 11 : i64} {
  func.func @_metric_kernel_lanes(%arg0: i32, %arg1: i32, %arg2: memref<4x128xf32, #tpu.memory_space<vmem>>, %arg3: memref<1x128xi32, #tpu.memory_space<vmem>>, %arg4: memref<1x128xi32, #tpu.memory_space<vmem>>, %arg5: memref<1x4x4xi32, #tpu.memory_space<vmem>>) attributes {dimension_semantics = [#tpu.dimension_semantics<parallel>, #tpu.dimension_semantics<arbitrary>], iteration_bounds = array<i64: 1, 1>, scalar_prefetch = 0 : i64, scratch_operands = 0 : i64, tpu.core_type = #tpu.core_type<tc>, window_params = [{transform_indices = @transform_0, window_bounds = array<i64: 4, 128>}, {transform_indices = @transform_1, window_bounds = array<i64: 1, 128>}, {transform_indices = @transform_2, window_bounds = array<i64: 1, 128>}, {transform_indices = @transform_3, window_bounds = array<i64: 1, 4, 4>}]} {
    %c0_i32 = arith.constant 0 : i32
    %0 = arith.cmpi eq, %arg1, %c0_i32 : i32
    %1 = arith.extui %0 : i1 to i32
    %c0_i32_0 = arith.constant 0 : i32
    %2 = arith.cmpi ne, %1, %c0_i32_0 : i32
    scf.if %2 {
      %c0_i32_14 = arith.constant 0 : i32
      %33 = vector.broadcast %c0_i32_14 : i32 to vector<4x4xi32>
      %c0_15 = arith.constant 0 : index
      %c0_16 = arith.constant 0 : index
      %c0_17 = arith.constant 0 : index
      %34 = vector.load %arg5[%c0_15, %c0_16, %c0_17] : memref<1x4x4xi32, #tpu.memory_space<vmem>>, vector<1x4x4xi32>
      %35 = vector.shape_cast %34 : vector<1x4x4xi32> to vector<4x4xi32>
      %36 = vector.shape_cast %33 : vector<4x4xi32> to vector<1x4x4xi32>
      tpu.vector_store %arg5[%c0_15, %c0_16, %c0_17], %36 {strides = array<i32>} : memref<1x4x4xi32, #tpu.memory_space<vmem>>, vector<1x4x4xi32>,
    } else {
    }
    %c0 = arith.constant 0 : index
    %c0_1 = arith.constant 0 : index
    %3 = vector.load %arg2[%c0, %c0_1] : memref<4x128xf32, #tpu.memory_space<vmem>>, vector<4x128xf32>
    %4 = tpu.iota {dimensions = array<i32: 0>} : vector<4x128xi32>
    %cst = arith.constant dense<0xFF800000> : vector<128xf32>
    %5 = vector.multi_reduction <maximumf>, %3, %cst [0] : vector<4x128xf32> to vector<128xf32>
    %6 = vector.shape_cast %5 : vector<128xf32> to vector<1x128xf32>
    %7 = vector.broadcast %6 : vector<1x128xf32> to vector<4x128xf32>
    %8 = arith.cmpf oeq, %3, %7 : vector<4x128xf32>
    %c4_i32 = arith.constant 4 : i32
    %9 = vector.broadcast %c4_i32 : i32 to vector<4x128xi32>
    %10 = arith.select %8, %4, %9 : vector<4x128xi1>, vector<4x128xi32>
    %cst_2 = arith.constant dense<2147483647> : vector<128xi32>
    %11 = vector.multi_reduction <minsi>, %10, %cst_2 [0] : vector<4x128xi32> to vector<128xi32>
    %12 = vector.shape_cast %11 : vector<128xi32> to vector<1x128xi32>
    %c0_3 = arith.constant 0 : index
    %c0_4 = arith.constant 0 : index
    %13 = vector.load %arg4[%c0_3, %c0_4] : memref<1x128xi32, #tpu.memory_space<vmem>>, vector<1x128xi32>
    tpu.vector_store %arg4[%c0_3, %c0_4], %12 {strides = array<i32>} : memref<1x128xi32, #tpu.memory_space<vmem>>, vector<1x128xi32>,
    %c0_5 = arith.constant 0 : index
    %c0_6 = arith.constant 0 : index
    %14 = vector.load %arg3[%c0_5, %c0_6] : memref<1x128xi32, #tpu.memory_space<vmem>>, vector<1x128xi32>
    %15 = vector.broadcast %12 : vector<1x128xi32> to vector<4x128xi32>
    %16 = arith.cmpi eq, %4, %15 : vector<4x128xi32>
    %17 = arith.extui %16 : vector<4x128xi1> to vector<4x128xi32>
    %18 = arith.sitofp %17 : vector<4x128xi32> to vector<4x128xf32>
    %19 = arith.truncf %18 : vector<4x128xf32> to vector<4x128xbf16>
    %20 = vector.broadcast %14 : vector<1x128xi32> to vector<4x128xi32>
    %21 = arith.cmpi eq, %4, %20 : vector<4x128xi32>
    %22 = arith.extui %21 : vector<4x128xi1> to vector<4x128xi32>
    %23 = arith.sitofp %22 : vector<4x128xi32> to vector<4x128xf32>
    %24 = arith.truncf %23 : vector<4x128xf32> to vector<4x128xbf16>
    %cst_7 = arith.constant dense<0.000000e+00> : vector<4x4xf32>
    %25 = tpu.matmul %24, %19, %cst_7 {dimension_numbers = #tpu.dot_dimension_numbers<[1], [1], [0], [0], [0, 0, 1, 0], [], []>} : vector<4x128xbf16>, vector<4x128xbf16>, vector<4x4xf32> -> vector<4x4xf32>
    %c0_8 = arith.constant 0 : index
    %c0_9 = arith.constant 0 : index
    %c0_10 = arith.constant 0 : index
    %26 = vector.load %arg5[%c0_8, %c0_9, %c0_10] : memref<1x4x4xi32, #tpu.memory_space<vmem>>, vector<1x4x4xi32>
    %27 = vector.shape_cast %26 : vector<1x4x4xi32> to vector<4x4xi32>
    %28 = arith.fptosi %25 : vector<4x4xf32> to vector<4x4xi32>
    %29 = arith.addi %27, %28 : vector<4x4xi32>
    %c0_11 = arith.constant 0 : index
    %c0_12 = arith.constant 0 : index
    %c0_13 = arith.constant 0 : index
    %30 = vector.load %arg5[%c0_11, %c0_12, %c0_13] : memref<1x4x4xi32, #tpu.memory_space<vmem>>, vector<1x4x4xi32>
    %31 = vector.shape_cast %30 : vector<1x4x4xi32> to vector<4x4xi32>
    %32 = vector.shape_cast %29 : vector<4x4xi32> to vector<1x4x4xi32>
    tpu.vector_store %arg5[%c0_11, %c0_12, %c0_13], %32 {strides = array<i32>} : memref<1x4x4xi32, #tpu.memory_space<vmem>>, vector<1x4x4xi32>,
    return
  }
  func.func @transform_0(%arg0: i32, %arg1: i32) -> (i32, i32) {
    %c1_i32 = arith.constant 1 : i32
    %0 = arith.muli %arg0, %c1_i32 : i32
    %1 = arith.addi %0, %arg1 : i32
    %c0_i32 = arith.constant 0 : i32
    %c0_i32_0 = arith.constant 0 : i32
    return %c0_i32, %1 : i32, i32
  }
  func.func @transform_1(%arg0: i32, %arg1: i32) -> (i32, i32) {
    %c1_i32 = arith.constant 1 : i32
    %0 = arith.muli %arg0, %c1_i32 : i32
    %1 = arith.addi %0, %arg1 : i32
    %c0_i32 = arith.constant 0 : i32
    %c0_i32_0 = arith.constant 0 : i32
    return %c0_i32, %1 : i32, i32
  }
  func.func @transform_2(%arg0: i32, %arg1: i32) -> (i32, i32) {
    %c1_i32 = arith.constant 1 : i32
    %0 = arith.muli %arg0, %c1_i32 : i32
    %1 = arith.addi %0, %arg1 : i32
    %c0_i32 = arith.constant 0 : i32
    %c0_i32_0 = arith.constant 0 : i32
    return %c0_i32, %1 : i32, i32
  }
  func.func @transform_3(%arg0: i32, %arg1: i32) -> (i32, i32, i32) {
    %c0_i32 = arith.constant 0 : i32
    %c0_i32_0 = arith.constant 0 : i32
    %c0_i32_1 = arith.constant 0 : i32
    return %arg0, %c0_i32, %c0_i32_0 : i32, i32, i32
  }
}

</mosaic_0001>

<bundles_post_ra>
// kernel: preds_and_confusion.1
= control target key start
LH: loop header
LB: loop body
LE: loop exit
PB: predicated region body
PF: predicated region fallthrough
CT: control target
= control target key end

     0   :  { %vm64_vm0 = vcmask 1043456   ;;  %v229_v1 = vmov 0.0   ;;  %vm59_vm1 = vcmask 27648   ;;  %vm230_vm2 = vmmov 0   ;;  %s279_s0 = inlined_call_operand.vmem [shape: f32[4,128], index: 0, kind: input, shape index: {}]   ;;  %s280_s1 = inlined_call_operand.vmem [shape: s32[1,128], index: 1, kind: input, shape index: {}]   ;;  %s281_s2 = inlined_call_operand.vmem [shape: s32[1,128], index: 2, kind: output, shape index: {0}]   ;;  %s282_s3 = inlined_call_operand.hbm [shape: s32[1,4,4], index: 3, kind: output, shape index: {1}]  }
   0x1   :  { %v61_v0 = vld [vmem:[%s279_s0] sm:$0xf]  ;;  %192 = vmatprep.subr.bf16.mxu0 %v229_v1  ;;  %194 = vmatprep.mubr.msk.bf16.mxu0 %vm230_vm2, %v229_v1  ;;  %v231_v4 = vmov 0  }
   0x2   :  { %v65_v2 = vsel %vm64_vm0, %v61_v0, -inf  ;;  %60 = vst.msk [vmem:[#allocation2] sm:$0xf] %vm59_vm1, %v231_v4 }
   0x3   :  { %v66_v3 = vrot.slane %v65_v2, 4 }
   0x4   :  { %9 = vsyncpa [#allocation3], 0  ;;  %v62_v7 = vlaneseq  ;;  %v184_v20 = vld [vmem:[%s280_s1] ss:$0 sm:$0xff]  ;;  %v232_v21 = vmov 1.0|1.0  }
   0x5   :  { %v67_v5 = vmax.f32 %v65_v2, %v66_v3  ;;  %s233_s17 = smov [#allocation2]  }
   0x6   :  { %v63_v10 = vshrl.u32 %v62_v7, 7  ;;  %s156_s18 = sshll.u32 %s233_s17, 4  ;;  %s157_s18 = int_to_ptr.vmem [resolvable:$true] %s156_s18 }
   0x7   :  { %v68_v6 = vrot.slane %v67_v5, 2  ;;  %s205_s1 = scalar_lea.vmem %s157_s18, 64  ;;  %p210_p1 = scmp.lt.s32.totalorder %s157_s18, %s157_s18 }
   0x8   :  { %vm94_vm9 = vcmp.eq.s32.totalorder %v63_v10, %v184_v20  ;;  %p206_p0 = scmp.ne.s32.totalorder %s157_s18, %s205_s1  ;;  %p211_p2 = scmp.lt.s32.totalorder %s205_s1, %s205_s1 }
   0x9   :  { %v69_v8 = vmax.f32 %v67_v5, %v68_v6  ;;  %vm188_vm10 = vmpackc.low %vm94_vm9, %vm94_vm9  ;;  %v138_v25 = vld [vmem:[#allocation2] sm:$0xf] }
   0xa   :  { %p212_p3 = por %p211_p2, %p210_p1 }
   0xb   :  { %v70_v9 = vrot.slane %v69_v8, 1 }
   0xc   :  { %p213_p4 = pnand %p212_p3, %p206_p0 }
   0xd   :  { %v71_v11 = vmax.f32 %v69_v8, %v70_v9 }
   0xf   :  { %vm72_vm3 = vcmp.eq.f32.partialorder %v61_v0, %v71_v11 }
  0x10   :  { %v73_v12 = vsel %vm72_vm3, %v63_v10, 4 }
  0x11   :  { %v74_v13 = vsel %vm64_vm0, %v73_v12, 2147483647 }
  0x12   :  { %v75_v14 = vrot.slane %v74_v13, 4 }
  0x14   :  { %vm76_vm4 = vcmp.lt.s32.totalorder %v74_v13, %v75_v14 }
  0x15   :  { %v77_v15 = vsel %vm76_vm4, %v74_v13, %v75_v14 }
  0x16   :  { %v78_v16 = vrot.slane %v77_v15, 2 }
  0x18   :  { %vm79_vm5 = vcmp.lt.s32.totalorder %v77_v15, %v78_v16 }
  0x19   :  { %v80_v17 = vsel %vm79_vm5, %v77_v15, %v78_v16 }
  0x1a   :  { %v81_v18 = vrot.slane %v80_v17, 1 }
  0x1c   :  { %vm82_vm6 = vcmp.lt.s32.totalorder %v80_v17, %v81_v18 }
  0x1d   :  { %v83_v19 = vsel %vm82_vm6, %v80_v17, %v81_v18 }
  0x1e   :  { %84 = vst [vmem:[%s281_s2] sm:$0x1] %v83_v19  ;;  %vm86_vm7 = vcmp.eq.s32.totalorder %v63_v10, %v83_v19 }
  0x1f   :  { %vm186_vm8 = vmpackc.low %vm86_vm7, %vm86_vm7 }
  0x20   :  { %193 = vmatpush3.bf16.xpose.msk.msra.mxu0 %vm186_vm8, %v232_v21 }
  0x27   :  { %195 = vmatmul.mubr.msk.bf16.vlgmr.msra.gmra.mrb[0].mxu0 %vm188_vm10, %v232_v21 }
  0xfa   :  { %v132_v22 = vpop.f32.mrb[0].mxu0 }
  0xfb   :  { %v198_v23 = vtrunc.f32 %v132_v22  ;;  %v196_v24 = vpop.f32.mrb[1].mxu0 }
  0xfc   :  { %v135_v26 = vpop.f32.mrb[2].mxu0 }
  0xfd   :  { %v199_v27 = vcvt.f32.s32 %v198_v23  ;;  %v197_v28 = vpop.f32.mrb[3].mxu0 }
  0xff   :  { %v140_v29 = vadd.s32 %v199_v27, %v138_v25 }
 0x101   :  { %142 = vst.msk [vmem:[#allocation2] sm:$0xf] %vm59_vm1, %v140_v29 }
 0x102   :  { %216 = shalt.err (!%p213_p4)
}
 0x103   :  { %s217_s20 = scalar_lea.hbm %s282_s3, 64 }
 0x104   :  { %p218_p5 = scmp.ne.s32.totalorder %s282_s3, %s217_s20  ;;  %p221_p6 = scmp.lt.u32.totalorder %s217_s20, %s282_s3 }
 0x106   :  { %p223_p7 = pnand %p221_p6, %p218_p5 }
 0x108   :  { %226 = shalt.err (!%p223_p7)
}
 0x109   :  { %159 = dma.vmem_to_hbm [thread:$0]  %s157_s18, 64, %s282_s3, [#allocation3]  }
 0x10a   :  { %227 = dma.done.wait [#allocation3], 64  }
 0x10b   :  { %228 = vsyncadd [#allocation3], 4294967232 }
 0x10c   :  { %169 = vsyncpa [#allocation3], 1 }

</bundles_post_ra>
